<compile_context>
chip_gen: v5e
topology: v5e:2x2
jax: 0.10.0
libtpu: 0.0.40
codegen_flags: <defaults>
</compile_context>

<pallas_src>
import jax
import jax.numpy as jnp
from jax.experimental import pallas as pl
from jax.experimental.pallas import tpu as pltpu


def _head_compute(x_ref, w1_ref, b1_ref, w2_ref, b2_ref, w3_ref, b3_ref):
    """Shared body: 3-layer MLP head. bf16 matmul operands, f32 everywhere else."""
    x = x_ref[...].astype(jnp.bfloat16)                                   # [B, H]

    h1 = jnp.dot(x, w1_ref[...], preferred_element_type=jnp.float32) + b1_ref[...]
    h1 = jnp.maximum(h1, 0.0)                     # ReLU (Dropout = identity in eval)

    h2 = jnp.dot(h1.astype(jnp.bfloat16), w2_ref[...],
                 preferred_element_type=jnp.float32) + b2_ref[...]
    h2 = jnp.maximum(h2, 0.0)                     # ReLU (Dropout = identity in eval)

    # Final Linear(H/4, 1): lane-dense row weight -> VPU multiply + lane reduction.
    w3_row = w3_ref[...].astype(jnp.float32)                              # [1, H/4]
    logits = jnp.sum(h2 * w3_row, axis=-1, keepdims=True) + b3_ref[...]   # [B, 1]
    return jnp.tanh(logits)


def _head_kernel(x_ref, w1_ref, b1_ref, w2_ref, b2_ref, w3_ref, b3_ref, o_ref):
    o_ref[...] = _head_compute(
        x_ref, w1_ref, b1_ref, w2_ref, b2_ref, w3_ref, b3_ref
    ).astype(o_ref.dtype)


def _head_loss_kernel(x_ref, w1_ref, b1_ref, w2_ref, b2_ref, w3_ref, b3_ref,
                      labels_ref, o_ref, loss_ref):
    """Fused head + MSELoss(reduction='mean') on logits.squeeze(-1) vs labels."""
    logits = _head_compute(x_ref, w1_ref, b1_ref, w2_ref, b2_ref, w3_ref, b3_ref)
    o_ref[...] = logits.astype(o_ref.dtype)
    d = logits - labels_ref[...]                                          # [B, 1]
    loss_ref[...] = (jnp.sum(d * d) * (1.0 / d.shape[0])).reshape(1, 1)


def _full_spec(shape):
    return pl.BlockSpec(shape, lambda: (0,) * len(shape))


_COMPILER_PARAMS = pltpu.CompilerParams(vmem_limit_bytes=4 << 20)


@jax.jit
def classification_head(embeds, params):
    """embeds: [B, H] f32 -> logits [B, 1] f32 (no-labels path)."""
    B, _ = embeds.shape
    w1, b1, w2, b2, w3, b3 = (params["w1"], params["b1"], params["w2"],
                              params["b2"], params["w3"], params["b3"])
    return pl.pallas_call(
        _head_kernel,
        out_shape=jax.ShapeDtypeStruct((B, 1), jnp.float32),
        grid=(),
        in_specs=[_full_spec(embeds.shape),
                  _full_spec(w1.shape), _full_spec(b1.shape),
                  _full_spec(w2.shape), _full_spec(b2.shape),
                  _full_spec(w3.shape), _full_spec(b3.shape)],
        out_specs=_full_spec((B, 1)),
        compiler_params=_COMPILER_PARAMS,
    )(embeds, w1, b1, w2, b2, w3, b3)


@jax.jit
def classification_head_with_loss(embeds, params, labels):
    """Fused head + MSE loss: one kernel launch, no logits HBM round-trip."""
    B, _ = embeds.shape
    w1, b1, w2, b2, w3, b3 = (params["w1"], params["b1"], params["w2"],
                              params["b2"], params["w3"], params["b3"])
    labels_col = labels.astype(jnp.float32).reshape(B, 1)
    logits, loss = pl.pallas_call(
        _head_loss_kernel,
        out_shape=(jax.ShapeDtypeStruct((B, 1), jnp.float32),
                   jax.ShapeDtypeStruct((1, 1), jnp.float32)),
        grid=(),
        in_specs=[_full_spec(embeds.shape),
                  _full_spec(w1.shape), _full_spec(b1.shape),
                  _full_spec(w2.shape), _full_spec(b2.shape),
                  _full_spec(w3.shape), _full_spec(b3.shape),
                  _full_spec((B, 1))],
        out_specs=(_full_spec((B, 1)), _full_spec((1, 1))),
        compiler_params=_COMPILER_PARAMS,
    )(embeds, w1, b1, w2, b2, w3, b3, labels_col)
    return logits, loss[0, 0]


def residual_model_forward(embeds, params, labels=None):
    """Mirrors ResidualModel.forward given the encoder's pooled embeddings."""
    if labels is not None:
        logits, loss = classification_head_with_loss(embeds, params, labels)
        return {"loss": loss, "logits": logits}
    return {"logits": classification_head(embeds, params)}


def init_head_params(key, hidden_size):
    """torch.nn.Linear-style init; weights stored bf16 as [in, out] (w3 as a row)."""
    h, h2, h4 = hidden_size, hidden_size // 2, hidden_size // 4
    ks = jax.random.split(key, 6)

    def linear(kw, kb, fan_in, fan_out):
        bound = float(fan_in) ** -0.5
        w = jax.random.uniform(kw, (fan_in, fan_out), jnp.float32, -bound, bound)
        b = jax.random.uniform(kb, (1, fan_out), jnp.float32, -bound, bound)
        return w.astype(jnp.bfloat16), b  # bf16 weights, f32 biases

    w1, b1 = linear(ks[0], ks[1], h, h2)
    w2, b2 = linear(ks[2], ks[3], h2, h4)
    w3, b3 = linear(ks[4], ks[5], h4, 1)
    w3 = w3.reshape(1, h4)  # lane-dense row for the VPU-reduce final layer
    return {"w1": w1, "b1": b1, "w2": w2, "b2": b2, "w3": w3, "b3": b3}


if __name__ == "__main__":
    # 'luar' config -> hidden_size = 512; small batch of 8 pooled embeddings.
    B, H = 8, 512
    key = jax.random.PRNGKey(0)
    k_emb, k_par, k_lab = jax.random.split(key, 3)

    embeds = jax.random.normal(k_emb, (B, H), jnp.float32)
    params = init_head_params(k_par, H)
    labels = jax.random.uniform(k_lab, (B,), jnp.float32, -1.0, 1.0)

    out = residual_model_forward(embeds, params, labels=labels)
    out_nolabel = residual_model_forward(embeds, params)
    jax.block_until_ready(out["logits"])
    jax.block_until_ready(out["loss"])
    jax.block_until_ready(out_nolabel["logits"])

    # Pure-JAX reference mirroring the kernel math (bf16 weights, f32 accumulation).
    xb = embeds.astype(jnp.bfloat16)
    h1 = jnp.maximum(
        jnp.dot(xb, params["w1"], preferred_element_type=jnp.float32) + params["b1"],
        0.0)
    h2 = jnp.maximum(
        jnp.dot(h1.astype(jnp.bfloat16), params["w2"],
                preferred_element_type=jnp.float32) + params["b2"],
        0.0)
    ref_logits = jnp.tanh(
        jnp.sum(h2 * params["w3"].astype(jnp.float32), axis=-1, keepdims=True)
        + params["b3"])
    ref_loss = jnp.mean((ref_logits[:, 0] - labels) ** 2)

    assert jnp.allclose(out["logits"], ref_logits, atol=5e-3), "logits mismatch"
    assert jnp.allclose(out["loss"], ref_loss, atol=5e-3), "loss mismatch"
    assert jnp.allclose(out_nolabel["logits"], out["logits"], atol=1e-6), "path mismatch"

    print("KERNEL_OK")
</pallas_src>

<mosaic_0001>
module attributes {stable_mosaic.version = 11 : i64} {
  func.func @_head_loss_kernel(%arg0: memref<8x512xf32, #tpu.memory_space<vmem>>, %arg1: memref<512x256xbf16, #tpu.memory_space<vmem>>, %arg2: memref<1x256xf32, #tpu.memory_space<vmem>>, %arg3: memref<256x128xbf16, #tpu.memory_space<vmem>>, %arg4: memref<1x128xf32, #tpu.memory_space<vmem>>, %arg5: memref<1x128xbf16, #tpu.memory_space<vmem>>, %arg6: memref<1x1xf32, #tpu.memory_space<vmem>>, %arg7: memref<8x1xf32, #tpu.memory_space<vmem>>, %arg8: memref<8x1xf32, #tpu.memory_space<vmem>>, %arg9: memref<1x1xf32, #tpu.memory_space<vmem>>) attributes {dimension_semantics = [], scalar_prefetch = 0 : i64, scratch_operands = 0 : i64, tpu.core_type = #tpu.core_type<tc>} {
    %c0 = arith.constant 0 : index
    %c0_0 = arith.constant 0 : index
    %0 = vector.load %arg0[%c0, %c0_0] : memref<8x512xf32, #tpu.memory_space<vmem>>, vector<8x512xf32>
    %1 = arith.truncf %0 : vector<8x512xf32> to vector<8x512xbf16>
    %c0_1 = arith.constant 0 : index
    %c0_2 = arith.constant 0 : index
    %2 = vector.load %arg1[%c0_1, %c0_2] : memref<512x256xbf16, #tpu.memory_space<vmem>>, vector<512x256xbf16>
    %cst = arith.constant dense<0.000000e+00> : vector<8x256xf32>
    %3 = tpu.matmul %1, %2, %cst {dimension_numbers = #tpu.dot_dimension_numbers<[1], [0], [0], [1], [0, 0, 1, 1], [], []>} : vector<8x512xbf16>, vector<512x256xbf16>, vector<8x256xf32> -> vector<8x256xf32>
    %c0_3 = arith.constant 0 : index
    %c0_4 = arith.constant 0 : index
    %4 = vector.load %arg2[%c0_3, %c0_4] : memref<1x256xf32, #tpu.memory_space<vmem>>, vector<1x256xf32>
    %5 = vector.broadcast %4 : vector<1x256xf32> to vector<8x256xf32>
    %6 = arith.addf %3, %5 : vector<8x256xf32>
    %cst_5 = arith.constant 0.000000e+00 : f32
    %7 = vector.broadcast %cst_5 : f32 to vector<8x256xf32>
    %8 = arith.maximumf %6, %7 : vector<8x256xf32>
    %9 = arith.truncf %8 : vector<8x256xf32> to vector<8x256xbf16>
    %c0_6 = arith.constant 0 : index
    %c0_7 = arith.constant 0 : index
    %10 = vector.load %arg3[%c0_6, %c0_7] : memref<256x128xbf16, #tpu.memory_space<vmem>>, vector<256x128xbf16>
    %cst_8 = arith.constant dense<0.000000e+00> : vector<8x128xf32>
    %11 = tpu.matmul %9, %10, %cst_8 {dimension_numbers = #tpu.dot_dimension_numbers<[1], [0], [0], [1], [0, 0, 1, 1], [], []>} : vector<8x256xbf16>, vector<256x128xbf16>, vector<8x128xf32> -> vector<8x128xf32>
    %c0_9 = arith.constant 0 : index
    %c0_10 = arith.constant 0 : index
    %12 = vector.load %arg4[%c0_9, %c0_10] : memref<1x128xf32, #tpu.memory_space<vmem>>, vector<1x128xf32>
    %13 = vector.broadcast %12 : vector<1x128xf32> to vector<8x128xf32>
    %14 = arith.addf %11, %13 : vector<8x128xf32>
    %cst_11 = arith.constant 0.000000e+00 : f32
    %15 = vector.broadcast %cst_11 : f32 to vector<8x128xf32>
    %16 = arith.maximumf %14, %15 : vector<8x128xf32>
    %c0_12 = arith.constant 0 : index
    %c0_13 = arith.constant 0 : index
    %17 = vector.load %arg5[%c0_12, %c0_13] : memref<1x128xbf16, #tpu.memory_space<vmem>>, vector<1x128xbf16>
    %18 = arith.extf %17 : vector<1x128xbf16> to vector<1x128xf32>
    %19 = vector.broadcast %18 : vector<1x128xf32> to vector<8x128xf32>
    %20 = arith.mulf %16, %19 : vector<8x128xf32>
    %cst_14 = arith.constant dense<0.000000e+00> : vector<8xf32>
    %21 = vector.multi_reduction <add>, %20, %cst_14 [1] : vector<8x128xf32> to vector<8xf32>
    %22 = vector.shape_cast %21 : vector<8xf32> to vector<8x1xf32>
    %c0_15 = arith.constant 0 : index
    %c0_16 = arith.constant 0 : index
    %23 = vector.load %arg6[%c0_15, %c0_16] : memref<1x1xf32, #tpu.memory_space<vmem>>, vector<1x1xf32>
    %24 = vector.broadcast %23 : vector<1x1xf32> to vector<8x1xf32>
    %25 = arith.addf %22, %24 : vector<8x1xf32>
    %26 = math.tanh %25 : vector<8x1xf32>
    %c0_17 = arith.constant 0 : index
    %c0_18 = arith.constant 0 : index
    %27 = vector.load %arg8[%c0_17, %c0_18] : memref<8x1xf32, #tpu.memory_space<vmem>>, vector<8x1xf32>
    tpu.vector_store %arg8[%c0_17, %c0_18], %26 {strides = array<i32>} : memref<8x1xf32, #tpu.memory_space<vmem>>, vector<8x1xf32>,
    %c0_19 = arith.constant 0 : index
    %c0_20 = arith.constant 0 : index
    %28 = vector.load %arg7[%c0_19, %c0_20] : memref<8x1xf32, #tpu.memory_space<vmem>>, vector<8x1xf32>
    %29 = arith.subf %26, %28 : vector<8x1xf32>
    %30 = arith.mulf %29, %29 : vector<8x1xf32>
    %31 = vector.shape_cast %30 : vector<8x1xf32> to vector<1x8x1xf32>
    %cst_21 = arith.constant dense<0.000000e+00> : vector<1xf32>
    %32 = vector.multi_reduction <add>, %31, %cst_21 [1, 2] : vector<1x8x1xf32> to vector<1xf32>
    %33 = vector.shape_cast %32 : vector<1xf32> to vector<1x1x1xf32>
    %34 = vector.extract %33[0, 0, 0] : f32 from vector<1x1x1xf32>
    %cst_22 = arith.constant 1.250000e-01 : f32
    %35 = arith.mulf %34, %cst_22 : f32
    %36 = vector.broadcast %35 : f32 to vector<1x1xf32>
    %c0_23 = arith.constant 0 : index
    %c0_24 = arith.constant 0 : index
    %37 = vector.load %arg9[%c0_23, %c0_24] : memref<1x1xf32, #tpu.memory_space<vmem>>, vector<1x1xf32>
    tpu.vector_store %arg9[%c0_23, %c0_24], %36 {strides = array<i32>} : memref<1x1xf32, #tpu.memory_space<vmem>>, vector<1x1xf32>,
    return
  }
}

</mosaic_0001>

<bundles_post_ra>
// kernel: classification_head_with_loss.1
= control target key start
LH: loop header
LB: loop body
LE: loop exit
PB: predicated region body
PF: predicated region fallthrough
CT: control target
= control target key end

     0   :  { %s1417_s0 = inlined_call_operand.hbm [shape: f32[8,512], index: 0, kind: input, shape index: {}]   ;;  %s1418_s1 = inlined_call_operand.hbm [shape: bf16[512,256], index: 1, kind: input, shape index: {}]   ;;  %s1419_s2 = inlined_call_operand.vmem [shape: f32[1,256], index: 2, kind: input, shape index: {}]   ;;  %s1420_s3 = inlined_call_operand.hbm [shape: bf16[256,128], index: 3, kind: input, shape index: {}]   ;;  %s1421_s4 = inlined_call_operand.vmem [shape: f32[1,128], index: 4, kind: input, shape index: {}]   ;;  %s1422_s5 = inlined_call_operand.vmem [shape: bf16[1,128], index: 5, kind: input, shape index: {}]   ;;  %s1423_s6 = inlined_call_operand.<no memory space> [shape: f32[1,1], index: 6, kind: input, shape index: {}]   ;;  %s1424_s7 = inlined_call_operand.vmem [shape: f32[8,1], index: 7, kind: input, shape index: {}]   ;;  %s1425_s8 = inlined_call_operand.vmem [shape: f32[8,1], index: 8, kind: output, shape index: {0}]   ;;  %s1426_s9 = inlined_call_operand.hbm [shape: f32[1,1], index: 9, kind: output, shape index: {1}]  }
   0x1   :  { %v15_v0 = vstv %s1423_s6 }
   0x2   :  { %16 = vst [vmem:[#allocation2] sm:$0x1] %v15_v0 }
   0x3   :  { %17 = vsyncpa [#allocation4], 0 }
   0x4   :  { %18 = vsyncpa [#allocation7], 0  ;;  %s35_s13 = sshll.u32 %s1418_s1, 4  ;;  %s36_s13 = int_to_ptr.hbm [resolvable:$true] %s35_s13 }
   0x5   :  { %19 = vsyncpa [#allocation5], 0  ;;  %s1313_s14 = smov [#allocation6]   ;;  %s25_s18 = sshll.u32 %s1417_s0, 4  ;;  %s26_s18 = int_to_ptr.hbm [resolvable:$true] %s25_s18 }
   0x6   :  { %s37_s15 = sshll.u32 %s1313_s14, 4  ;;  %s1314_s19 = smov 128   ;;  %s38_s15 = int_to_ptr.vmem [resolvable:$true] %s37_s15 }
   0x7   :  { %s1315_s20 = smov 8   ;;  %s1316_s6 = smov [#allocation3]  }
   0x8   :  { %43 = dma.hbm_to_vmem [thread:$0]  %s36_s13, 8192, %s38_s15, [#allocation7], %s1314_s19, %s1314_s19, %s1315_s20  }
   0x9   :  { %s27_s21 = sshll.u32 %s1316_s6, 4  ;;  %s50_s24 = sshll.u32 %s1420_s3, 4  ;;  %s28_s21 = int_to_ptr.vmem [resolvable:$true] %s27_s21  ;;  %s51_s24 = int_to_ptr.hbm [resolvable:$true] %s50_s24 }
   0xa   :  { %30 = dma.hbm_to_vmem [thread:$0]  %s26_s18, 512, %s28_s21, [#allocation4]  }
   0xb   :  { %s1317_s1 = smov [#allocation8]   ;;  %s1318_s26 = smov 64  }
   0xc   :  { %s52_s25 = sshll.u32 %s1317_s1, 4  ;;  %s1319_s27 = smov 4   ;;  %s53_s25 = int_to_ptr.vmem [resolvable:$true] %s52_s25 }
   0xd   :  { %58 = dma.hbm_to_vmem [thread:$0]  %s51_s24, 2048, %s53_s25, [#allocation7], %s1318_s26, %s1318_s26, %s1319_s27  }
   0xe   :  { %1307 = dma.done.wait [#allocation4], 512  }
   0xf   :  { %1308 = vsyncadd [#allocation4], 4294966784 }
  0x10   :  { %1309 = dma.done.wait [#allocation7], 10240  }
  0x11   :  { %1310 = vsyncadd [#allocation7], 4294957056  ;;  %v855_v1 = vld [vmem:[#allocation6 + $0x70] sm:$0xf]  ;;  %v1132_v2 = vld [vmem:[#allocation6 + $0x74] sm:$0xf0] }
  0x12   :  { %v919_v3 = vld [vmem:[#allocation6 + $0xf0] sm:$0xf]  ;;  %v856_v4 = vor.u32 %v1132_v2, %v855_v1  ;;  %v1148_v5 = vld [vmem:[#allocation6 + $0xf4] sm:$0xf0]  ;;  %v847_v12 = vld [vmem:[#allocation6 + $0x60] sm:$0xf] }
  0x13   :  { %v983_v6 = vld [vmem:[#allocation6 + $0x170] sm:$0xf]  ;;  %v1164_v7 = vld [vmem:[#allocation6 + $0x174] sm:$0xf0]  ;;  %v920_v8 = vor.u32 %v1148_v5, %v919_v3  ;;  %v1130_v14 = vld [vmem:[#allocation6 + $0x64] sm:$0xf0] }
  0x14   :  { %v984_v9 = vor.u32 %v1164_v7, %v983_v6  ;;  %v1047_v10 = vld [vmem:[#allocation6 + $0x1f0] sm:$0xf]  ;;  %v1180_v11 = vld [vmem:[#allocation6 + $0x1f4] sm:$0xf0]  ;;  %477 = vmatpush.bf16.msra.mxu0 %v856_v4  ;;  %v911_v15 = vld [vmem:[#allocation6 + $0xe0] sm:$0xf]  ;;  %v848_v17 = vor.u32 %v1130_v14, %v847_v12 }
  0x15   :  { %v1048_v13 = vor.u32 %v1180_v11, %v1047_v10  ;;  %v1146_v16 = vld [vmem:[#allocation6 + $0xe4] sm:$0xf0]  ;;  %490 = vmatpush.bf16.msra.mxu1 %v920_v8  ;;  %v975_v19 = vld [vmem:[#allocation6 + $0x160] sm:$0xf]  ;;  %v839_v24 = vld [vmem:[#allocation6 + $0x50] sm:$0xf] }
  0x16   :  { %503 = vmatpush.bf16.msra.mxu2 %v984_v9  ;;  %v912_v18 = vor.u32 %v1146_v16, %v911_v15  ;;  %v1162_v20 = vld [vmem:[#allocation6 + $0x164] sm:$0xf0]  ;;  %v1039_v21 = vld [vmem:[#allocation6 + $0x1e0] sm:$0xf]  ;;  %v1128_v25 = vld [vmem:[#allocation6 + $0x54] sm:$0xf0] }
  0x17   :  { %516 = vmatpush.bf16.msra.mxu3 %v1048_v13  ;;  %v976_v22 = vor.u32 %v1162_v20, %v975_v19  ;;  %v1178_v23 = vld [vmem:[#allocation6 + $0x1e4] sm:$0xf0]  ;;  %v903_v27 = vld [vmem:[#allocation6 + $0xd0] sm:$0xf]  ;;  %v1144_v28 = vld [vmem:[#allocation6 + $0xd4] sm:$0xf0]  ;;  %v840_v30 = vor.u32 %v1128_v25, %v839_v24 }
  0x18   :  { %v1040_v26 = vor.u32 %v1178_v23, %v1039_v21  ;;  %v967_v29 = vld [vmem:[#allocation6 + $0x150] sm:$0xf]  ;;  %478 = vmatpush.bf16.msra.mxu0 %v848_v17  ;;  %v1160_v31 = vld [vmem:[#allocation6 + $0x154] sm:$0xf0]  ;;  %v904_v34 = vor.u32 %v1144_v28, %v903_v27  ;;  %v831_v36 = vld [vmem:[#allocation6 + $0x40] sm:$0xf] }
  0x19   :  { %v1031_v32 = vld [vmem:[#allocation6 + $0x1d0] sm:$0xf]  ;;  %v1176_v33 = vld [vmem:[#allocation6 + $0x1d4] sm:$0xf0]  ;;  %491 = vmatpush.bf16.msra.mxu1 %v912_v18  ;;  %v968_v35 = vor.u32 %v1160_v31, %v967_v29  ;;  %v1126_v37 = vld [vmem:[#allocation6 + $0x44] sm:$0xf0] }
  0x1a   :  { %504 = vmatpush.bf16.msra.mxu2 %v976_v22  ;;  %v895_v38 = vld [vmem:[#allocation6 + $0xc0] sm:$0xf]  ;;  %v1032_v39 = vor.u32 %v1176_v33, %v1031_v32  ;;  %v1142_v40 = vld [vmem:[#allocation6 + $0xc4] sm:$0xf0]  ;;  %v832_v45 = vor.u32 %v1126_v37, %v831_v36  ;;  %v823_v48 = vld [vmem:[#allocation6 + $0x30] sm:$0xf] }
  0x1b   :  { %517 = vmatpush.bf16.msra.mxu3 %v1040_v26  ;;  %v959_v41 = vld [vmem:[#allocation6 + $0x140] sm:$0xf]  ;;  %v1158_v42 = vld [vmem:[#allocation6 + $0x144] sm:$0xf0]  ;;  %v896_v46 = vor.u32 %v1142_v40, %v895_v38  ;;  %v1124_v49 = vld [vmem:[#allocation6 + $0x34] sm:$0xf0] }
  0x1c   :  { %v1023_v43 = vld [vmem:[#allocation6 + $0x1c0] sm:$0xf]  ;;  %v1174_v44 = vld [vmem:[#allocation6 + $0x1c4] sm:$0xf0]  ;;  %479 = vmatpush.bf16.msra.mxu0 %v840_v30  ;;  %v960_v47 = vor.u32 %v1158_v42, %v959_v41  ;;  %v887_v50 = vld [vmem:[#allocation6 + $0xb0] sm:$0xf]  ;;  %v824_v57 = vor.u32 %v1124_v49, %v823_v48 }
  0x1d   :  { %492 = vmatpush.bf16.msra.mxu1 %v904_v34  ;;  %v1024_v51 = vor.u32 %v1174_v44, %v1023_v43  ;;  %v1140_v52 = vld [vmem:[#allocation6 + $0xb4] sm:$0xf0]  ;;  %v951_v53 = vld [vmem:[#allocation6 + $0x130] sm:$0xf]  ;;  %v815_v60 = vld [vmem:[#allocation6 + $0x20] sm:$0xf] }
  0x1e   :  { %505 = vmatpush.bf16.msra.mxu2 %v968_v35  ;;  %v1156_v54 = vld [vmem:[#allocation6 + $0x134] sm:$0xf0]  ;;  %v1015_v55 = vld [vmem:[#allocation6 + $0x1b0] sm:$0xf]  ;;  %v888_v58 = vor.u32 %v1140_v52, %v887_v50  ;;  %v1122_v61 = vld [vmem:[#allocation6 + $0x24] sm:$0xf0] }
  0x1f   :  { %518 = vmatpush.bf16.msra.mxu3 %v1032_v39  ;;  %v1172_v56 = vld [vmem:[#allocation6 + $0x1b4] sm:$0xf0]  ;;  %v952_v59 = vor.u32 %v1156_v54, %v951_v53  ;;  %v879_v62 = vld [vmem:[#allocation6 + $0xa0] sm:$0xf]  ;;  %v1138_v0 = vld [vmem:[#allocation6 + $0xa4] sm:$0xf0]  ;;  %v816_v5 = vor.u32 %v1122_v61, %v815_v60 }
  0x20   :  { %480 = vmatpush.bf16.msra.mxu0 %v832_v45  ;;  %v1016_v63 = vor.u32 %v1172_v56, %v1015_v55  ;;  %v943_v1 = vld [vmem:[#allocation6 + $0x120] sm:$0xf]  ;;  %v1154_v2 = vld [vmem:[#allocation6 + $0x124] sm:$0xf0]  ;;  %v880_v6 = vor.u32 %v1138_v0, %v879_v62  ;;  %v807_v8 = vld [vmem:[#allocation6 + $0x10] sm:$0xf] }
  0x21   :  { %493 = vmatpush.bf16.msra.mxu1 %v896_v46  ;;  %v1007_v3 = vld [vmem:[#allocation6 + $0x1a0] sm:$0xf]  ;;  %v1170_v4 = vld [vmem:[#allocation6 + $0x1a4] sm:$0xf0]  ;;  %v944_v7 = vor.u32 %v1154_v2, %v943_v1  ;;  %v1120_v9 = vld [vmem:[#allocation6 + $0x14] sm:$0xf0] }
  0x22   :  { %506 = vmatpush.bf16.msra.mxu2 %v960_v47  ;;  %v871_v10 = vld [vmem:[#allocation6 + $0x90] sm:$0xf]  ;;  %v1008_v11 = vor.u32 %v1170_v4, %v1007_v3  ;;  %v1136_v12 = vld [vmem:[#allocation6 + $0x94] sm:$0xf0]  ;;  %v808_v17 = vor.u32 %v1120_v9, %v807_v8  ;;  %v799_v18 = vld [vmem:[#allocation6] sm:$0xf] }
  0x23   :  { %519 = vmatpush.bf16.msra.mxu3 %v1024_v51  ;;  %v935_v13 = vld [vmem:[#allocation6 + $0x110] sm:$0xf]  ;;  %v1152_v14 = vld [vmem:[#allocation6 + $0x114] sm:$0xf0]  ;;  %v1118_v19 = vld [vmem:[#allocation6 + $0x4] sm:$0xf0]  ;;  %v872_v20 = vor.u32 %v1136_v12, %v871_v10 }
  0x24   :  { %481 = vmatpush.bf16.msra.mxu0 %v824_v57  ;;  %v999_v15 = vld [vmem:[#allocation6 + $0x190] sm:$0xf]  ;;  %v1168_v16 = vld [vmem:[#allocation6 + $0x194] sm:$0xf0]  ;;  %v936_v21 = vor.u32 %v1152_v14, %v935_v13  ;;  %v863_v22 = vld [vmem:[#allocation6 + $0x80] sm:$0xf]  ;;  %v800_v32 = vor.u32 %v1118_v19, %v799_v18 }
  0x25   :  { %494 = vmatpush.bf16.msra.mxu1 %v888_v58  ;;  %v1134_v23 = vld [vmem:[#allocation6 + $0x84] sm:$0xf0]  ;;  %v927_v24 = vld [vmem:[#allocation6 + $0x100] sm:$0xf]  ;;  %v1000_v25 = vor.u32 %v1168_v16, %v999_v15  ;;  %v1131_v29 = vld [vmem:[#allocation6 + $0x74] sm:$0xf] }
  0x26   :  { %507 = vmatpush.bf16.msra.mxu2 %v952_v59  ;;  %v1150_v26 = vld [vmem:[#allocation6 + $0x104] sm:$0xf0]  ;;  %v991_v27 = vld [vmem:[#allocation6 + $0x180] sm:$0xf]  ;;  %v857_v30 = vld [vmem:[#allocation6 + $0x78] sm:$0xf0]  ;;  %v864_v36 = vor.u32 %v1134_v23, %v863_v22 }
  0x27   :  { %520 = vmatpush.bf16.msra.mxu3 %v1016_v63  ;;  %v1166_v28 = vld [vmem:[#allocation6 + $0x184] sm:$0xf0]  ;;  %v1147_v31 = vld [vmem:[#allocation6 + $0xf4] sm:$0xf]  ;;  %v921_v33 = vld [vmem:[#allocation6 + $0xf8] sm:$0xf0]  ;;  %v928_v37 = vor.u32 %v1150_v26, %v927_v24  ;;  %v860_v42 = vor.u32 %v1131_v29, %v857_v30 }
  0x28   :  { %482 = vmatpush.bf16.msra.mxu0 %v816_v5  ;;  %v1163_v34 = vld [vmem:[#allocation6 + $0x174] sm:$0xf]  ;;  %v985_v35 = vld [vmem:[#allocation6 + $0x178] sm:$0xf0]  ;;  %v992_v41 = vor.u32 %v1166_v28, %v991_v27  ;;  %v1129_v43 = vld [vmem:[#allocation6 + $0x64] sm:$0xf]  ;;  %v924_v46 = vor.u32 %v1147_v31, %v921_v33 }
  0x29   :  { %495 = vmatpush.bf16.msra.mxu1 %v880_v6  ;;  %v1179_v38 = vld [vmem:[#allocation6 + $0x1f4] sm:$0xf]  ;;  %v1049_v39 = vld [vmem:[#allocation6 + $0x1f8] sm:$0xf0]  ;;  %v849_v44 = vld [vmem:[#allocation6 + $0x68] sm:$0xf0]  ;;  %v988_v47 = vor.u32 %v1163_v34, %v985_v35 }
  0x2a   :  { %508 = vmatpush.bf16.msra.mxu2 %v944_v7  ;;  %v81_v40 = vld [vmem:[#allocation3 + $0x10] sm:$0xff]  ;;  %v79_v45 = vld [vmem:[#allocation3] sm:$0xff]  ;;  %v82_v49 = vld [vmem:[#allocation3 + $0x18] sm:$0xff]  ;;  %v1052_v51 = vor.u32 %v1179_v38, %v1049_v39  ;;  %v852_v60 = vor.u32 %v1129_v43, %v849_v44  ;;  %vm756_vm0 = vcmask 7168   ;;  %s1320_s12 = smov [#allocation9]   ;;  %s784_s15 = sshll.u32 %s1426_s9, 4  ;;  %s785_s15 = int_to_ptr.hbm [resolvable:$true] %s784_s15 }
  0x2b   :  { %521 = vmatpush.bf16.msra.mxu3 %v1008_v11  ;;  %v1145_v48 = vld [vmem:[#allocation6 + $0xe4] sm:$0xf]  ;;  %v80_v50 = vld [vmem:[#allocation3 + $0x8] sm:$0xff]  ;;  %v1383_v55 = vpack.c.bf16 %v81_v40, %v81_v40  ;;  %v1385_v58 = vpack.c.bf16 %v79_v45, %v79_v45  ;;  %v1387_v59 = vpack.c.bf16 %v82_v49, %v82_v49  ;;  %v1127_v0 = vld [vmem:[#allocation6 + $0x54] sm:$0xf]  ;;  %s782_s13 = sshll.u32 %s1320_s12, 4  ;;  %s783_s13 = int_to_ptr.vmem [resolvable:$true] %s782_s13 }
  0x2c   :  { %483 = vmatpush.bf16.msra.mxu0 %v808_v17  ;;  %v913_v52 = vld [vmem:[#allocation6 + $0xe8] sm:$0xf0]  ;;  %v1161_v53 = vld [vmem:[#allocation6 + $0x164] sm:$0xf]  ;;  %v1389_v61 = vpack.c.bf16 %v80_v50, %v80_v50  ;;  %v841_v1 = vld [vmem:[#allocation6 + $0x58] sm:$0xf0] }
  0x2d   :  { %496 = vmatpush.bf16.msra.mxu1 %v872_v20  ;;  %v977_v54 = vld [vmem:[#allocation6 + $0x168] sm:$0xf0]  ;;  %v1177_v56 = vld [vmem:[#allocation6 + $0x1e4] sm:$0xf]  ;;  %v916_v62 = vor.u32 %v1145_v48, %v913_v52  ;;  %v1143_v2 = vld [vmem:[#allocation6 + $0xd4] sm:$0xf]  ;;  %v844_v9 = vor.u32 %v1127_v0, %v841_v1 }
  0x2e   :  { %509 = vmatpush.bf16.msra.mxu2 %v936_v21  ;;  %v1041_v57 = vld [vmem:[#allocation6 + $0x1e8] sm:$0xf0]  ;;  %v980_v63 = vor.u32 %v1161_v53, %v977_v54  ;;  %v905_v4 = vld [vmem:[#allocation6 + $0xd8] sm:$0xf0]  ;;  %v1159_v5 = vld [vmem:[#allocation6 + $0x154] sm:$0xf] }
  0x2f   :  { %522 = vmatpush.bf16.msra.mxu3 %v1000_v25  ;;  %v1044_v3 = vor.u32 %v1177_v56, %v1041_v57  ;;  %v969_v6 = vld [vmem:[#allocation6 + $0x158] sm:$0xf0]  ;;  %v1175_v7 = vld [vmem:[#allocation6 + $0x1d4] sm:$0xf]  ;;  %v908_v10 = vor.u32 %v1143_v2, %v905_v4  ;;  %v1125_v12 = vld [vmem:[#allocation6 + $0x44] sm:$0xf] }
  0x30   :  { %484 = vmatpush.bf16.msra.mxu0 %v800_v32  ;;  %v1033_v8 = vld [vmem:[#allocation6 + $0x1d8] sm:$0xf0]  ;;  %v972_v11 = vor.u32 %v1159_v5, %v969_v6  ;;  %v833_v13 = vld [vmem:[#allocation6 + $0x48] sm:$0xf0]  ;;  %v1141_v14 = vld [vmem:[#allocation6 + $0xc4] sm:$0xf] }
  0x31   :  { %497 = vmatpush.bf16.msra.mxu1 %v864_v36  ;;  %v1036_v15 = vor.u32 %v1175_v7, %v1033_v8  ;;  %v897_v16 = vld [vmem:[#allocation6 + $0xc8] sm:$0xf0]  ;;  %v1157_v17 = vld [vmem:[#allocation6 + $0x144] sm:$0xf]  ;;  %v836_v21 = vor.u32 %v1125_v12, %v833_v13  ;;  %v1123_v24 = vld [vmem:[#allocation6 + $0x34] sm:$0xf] }
  0x32   :  { %510 = vmatpush.bf16.msra.mxu2 %v928_v37  ;;  %v961_v18 = vld [vmem:[#allocation6 + $0x148] sm:$0xf0]  ;;  %v1173_v19 = vld [vmem:[#allocation6 + $0x1c4] sm:$0xf]  ;;  %v900_v22 = vor.u32 %v1141_v14, %v897_v16  ;;  %v825_v25 = vld [vmem:[#allocation6 + $0x38] sm:$0xf0] }
  0x33   :  { %523 = vmatpush.bf16.msra.mxu3 %v992_v41  ;;  %485 = vmatmul.bf16.vlgmr.msra.gmra.mxu0 %v1385_v58  ;;  %v1025_v20 = vld [vmem:[#allocation6 + $0x1c8] sm:$0xf0]  ;;  %v964_v23 = vor.u32 %v1157_v17, %v961_v18  ;;  %v1139_v26 = vld [vmem:[#allocation6 + $0xb4] sm:$0xf]  ;;  %v889_v28 = vld [vmem:[#allocation6 + $0xb8] sm:$0xf0]  ;;  %v828_v33 = vor.u32 %v1123_v24, %v825_v25 }
  0x34   :  { %529 = vmatpush.bf16.msrb.mxu0 %v860_v42  ;;  %498 = vmatmul.bf16.vlgmr.msra.gmra.mxu1 %v1389_v61  ;;  %v1028_v27 = vor.u32 %v1173_v19, %v1025_v20  ;;  %v1155_v29 = vld [vmem:[#allocation6 + $0x134] sm:$0xf]  ;;  %v953_v30 = vld [vmem:[#allocation6 + $0x138] sm:$0xf0]  ;;  %v1121_v34 = vld [vmem:[#allocation6 + $0x24] sm:$0xf]  ;;  %v892_v35 = vor.u32 %v1139_v26, %v889_v28 }
  0x35   :  { %542 = vmatpush.bf16.msrb.mxu1 %v924_v46  ;;  %511 = vmatmul.bf16.vlgmr.msra.gmra.mxu2 %v1383_v55  ;;  %v1171_v31 = vld [vmem:[#allocation6 + $0x1b4] sm:$0xf]  ;;  %v1017_v32 = vld [vmem:[#allocation6 + $0x1b8] sm:$0xf0]  ;;  %v956_v36 = vor.u32 %v1155_v29, %v953_v30  ;;  %v817_v37 = vld [vmem:[#allocation6 + $0x28] sm:$0xf0] }
  0x36   :  { %555 = vmatpush.bf16.msrb.mxu2 %v988_v47  ;;  %524 = vmatmul.bf16.vlgmr.msra.gmra.mxu3 %v1387_v59  ;;  %v1137_v38 = vld [vmem:[#allocation6 + $0xa4] sm:$0xf]  ;;  %v1020_v39 = vor.u32 %v1171_v31, %v1017_v32  ;;  %v881_v40 = vld [vmem:[#allocation6 + $0xa8] sm:$0xf0]  ;;  %v820_v45 = vor.u32 %v1121_v34, %v817_v37  ;;  %v1119_v48 = vld [vmem:[#allocation6 + $0x14] sm:$0xf] }
  0x37   :  { %568 = vmatpush.bf16.msrb.mxu3 %v1052_v51  ;;  %v1153_v41 = vld [vmem:[#allocation6 + $0x124] sm:$0xf]  ;;  %v945_v42 = vld [vmem:[#allocation6 + $0x128] sm:$0xf0]  ;;  %v884_v46 = vor.u32 %v1137_v38, %v881_v40  ;;  %v809_v49 = vld [vmem:[#allocation6 + $0x18] sm:$0xf0] }
  0x38   :  { %530 = vmatpush.bf16.msrb.mxu0 %v852_v60  ;;  %v1169_v43 = vld [vmem:[#allocation6 + $0x1a4] sm:$0xf]  ;;  %v1009_v44 = vld [vmem:[#allocation6 + $0x1a8] sm:$0xf0]  ;;  %v948_v47 = vor.u32 %v1153_v41, %v945_v42  ;;  %v1135_v50 = vld [vmem:[#allocation6 + $0x94] sm:$0xf]  ;;  %v812_v60 = vor.u32 %v1119_v48, %v809_v49 }
  0x39   :  { %543 = vmatpush.bf16.msrb.mxu1 %v916_v62  ;;  %v1012_v51 = vor.u32 %v1169_v43, %v1009_v44  ;;  %v873_v52 = vld [vmem:[#allocation6 + $0x98] sm:$0xf0]  ;;  %v1151_v53 = vld [vmem:[#allocation6 + $0x114] sm:$0xf]  ;;  %v1117_v0 = vld [vmem:[#allocation6 + $0x4] sm:$0xf] }
  0x3a   :  { %556 = vmatpush.bf16.msrb.mxu2 %v980_v63  ;;  %v937_v54 = vld [vmem:[#allocation6 + $0x118] sm:$0xf0]  ;;  %v1167_v56 = vld [vmem:[#allocation6 + $0x194] sm:$0xf]  ;;  %v876_v62 = vor.u32 %v1135_v50, %v873_v52  ;;  %v801_v1 = vld [vmem:[#allocation6 + $0x8] sm:$0xf0] }
  0x3b   :  { %569 = vmatpush.bf16.msrb.mxu3 %v1044_v3  ;;  %v1001_v57 = vld [vmem:[#allocation6 + $0x198] sm:$0xf0]  ;;  %v940_v63 = vor.u32 %v1151_v53, %v937_v54  ;;  %v1133_v2 = vld [vmem:[#allocation6 + $0x84] sm:$0xf]  ;;  %v865_v4 = vld [vmem:[#allocation6 + $0x88] sm:$0xf0] }
  0x3c   :  { %531 = vmatpush.bf16.msrb.mxu0 %v844_v9  ;;  %v1004_v3 = vor.u32 %v1167_v56, %v1001_v57  ;;  %v1149_v5 = vld [vmem:[#allocation6 + $0x104] sm:$0xf]  ;;  %v929_v6 = vld [vmem:[#allocation6 + $0x108] sm:$0xf0]  ;;  %v804_v9 = vor.u32 %v1117_v0, %v801_v1  ;;  %v1188_v13 = vld [vmem:[#allocation8 + $0x38] sm:$0xff]  ;;  %vm773_vm1 = vcmask 0  }
  0x3d   :  { %544 = vmatpush.bf16.msrb.mxu1 %v908_v10  ;;  %v1165_v7 = vld [vmem:[#allocation6 + $0x184] sm:$0xf]  ;;  %v993_v8 = vld [vmem:[#allocation6 + $0x188] sm:$0xf0]  ;;  %v868_v10 = vor.u32 %v1133_v2, %v865_v4  ;;  %v1187_v14 = vld [vmem:[#allocation8 + $0x30] sm:$0xff] }
  0x3e   :  { %557 = vmatpush.bf16.msrb.mxu2 %v972_v11  ;;  %v932_v11 = vor.u32 %v1149_v5, %v929_v6  ;;  %v996_v12 = vor.u32 %v1165_v7, %v993_v8  ;;  %v1185_v16 = vld [vmem:[#allocation8 + $0x20] sm:$0xff]  ;;  %v1184_v17 = vld [vmem:[#allocation8 + $0x18] sm:$0xff]  ;;  %v1183_v18 = vld [vmem:[#allocation8 + $0x10] sm:$0xff] }
  0x3f   :  { %570 = vmatpush.bf16.msrb.mxu3 %v1036_v15  ;;  %v1186_v15 = vld [vmem:[#allocation8 + $0x28] sm:$0xff]  ;;  %v1196_v20 = vld [vmem:[#allocation8 + $0x78] sm:$0xff]  ;;  %v1191_v24 = vld [vmem:[#allocation8 + $0x50] sm:$0xff] }
  0x40   :  { %532 = vmatpush.bf16.msrb.mxu0 %v836_v21  ;;  %v1182_v19 = vld [vmem:[#allocation8 + $0x8] sm:$0xff]  ;;  %v1195_v21 = vld [vmem:[#allocation8 + $0x70] sm:$0xff]  ;;  %v1208_v8 = vld [vmem:[#allocation2] ss:$0 sm:$0xff] }
  0x41   :  { %545 = vmatpush.bf16.msrb.mxu1 %v900_v22  ;;  %v1192_v22 = vld [vmem:[#allocation8 + $0x58] sm:$0xff]  ;;  %v1190_v29 = vld [vmem:[#allocation8 + $0x48] sm:$0xff] }
  0x42   :  { %558 = vmatpush.bf16.msrb.mxu2 %v964_v23 }
  0x43   :  { %571 = vmatpush.bf16.msrb.mxu3 %v1028_v27 }
  0x44   :  { %533 = vmatpush.bf16.msrb.mxu0 %v828_v33 }
  0x45   :  { %546 = vmatpush.bf16.msrb.mxu1 %v892_v35  ;;  %v1189_v35 = vld [vmem:[#allocation8 + $0x40] sm:$0xff] }
  0x46   :  { %559 = vmatpush.bf16.msrb.mxu2 %v956_v36 }
  0x47   :  { %572 = vmatpush.bf16.msrb.mxu3 %v1020_v39 }
  0x48   :  { %534 = vmatpush.bf16.msrb.mxu0 %v820_v45 }
  0x49   :  { %547 = vmatpush.bf16.msrb.mxu1 %v884_v46 }
  0x4a   :  { %560 = vmatpush.bf16.msrb.mxu2 %v948_v47 }
  0x4b   :  { %573 = vmatpush.bf16.msrb.mxu3 %v1012_v51 }
  0x4c   :  { %535 = vmatpush.bf16.msrb.mxu0 %v812_v60 }
  0x4d   :  { %548 = vmatpush.bf16.msrb.mxu1 %v876_v62  ;;  %v744_v62 = vld [vmem:[%s1422_s5] sm:$0x1] }
  0x4e   :  { %561 = vmatpush.bf16.msrb.mxu2 %v940_v63  ;;  %v1207_v63 = vld [vmem:[%s1421_s4] ss:$0 sm:$0xff]  ;;  %v745_v0 = vunpack.c.l.bf16 %v744_v62 }
  0x4f   :  { %574 = vmatpush.bf16.msrb.mxu3 %v1004_v3 }
  0x50   :  { %536 = vmatpush.bf16.msrb.mxu0 %v804_v9  ;;  %v746_v4 = vperm.slane %v745_v0, 0 }
  0x51   :  { %549 = vmatpush.bf16.msrb.mxu1 %v868_v10 }
  0x52   :  { %562 = vmatpush.bf16.msrb.mxu2 %v932_v11  ;;  %v758_v11 = vld [vmem:[%s1424_s7] sm:$0xff] }
  0x53   :  { %575 = vmatpush.bf16.msrb.mxu3 %v996_v12  ;;  %537 = vmatmul.bf16.vlgmr.msrb.gmra.mxu0 %v1385_v58  ;;  %v1181_v58 = vld [vmem:[#allocation8] sm:$0xff] }
  0x54   :  { %717 = vmatpush.bf16.msra.mxu0 %v1188_v13  ;;  %550 = vmatmul.bf16.vlgmr.msrb.gmra.mxu1 %v1389_v61  ;;  %v151_v61 = vld [vmem:[%s1419_s2] sm:$0x3] }
  0x55   :  { %563 = vmatmul.bf16.vlgmr.msrb.gmra.mxu2 %v1383_v55  ;;  %730 = vmatpush.bf16.msra.mxu1 %v1196_v20  ;;  %v1194_v55 = vld [vmem:[#allocation8 + $0x68] sm:$0xff]  ;;  %v153_v23 = vperm.slane %v151_v61, 0  ;;  %v154_v41 = vperm.slane %v151_v61, 1 }
  0x56   :  { %576 = vmatmul.bf16.vlgmr.msrb.gmra.mxu3 %v1387_v59  ;;  %v1193_v59 = vld [vmem:[#allocation8 + $0x60] sm:$0xff] }
  0x58   :  { %718 = vmatpush.bf16.msra.mxu0 %v1187_v14 }
  0x59   :  { %731 = vmatpush.bf16.msra.mxu1 %v1195_v21 }
  0x5c   :  { %719 = vmatpush.bf16.msra.mxu0 %v1186_v15 }
  0x5d   :  { %732 = vmatpush.bf16.msra.mxu1 %v1194_v55 }
  0x60   :  { %720 = vmatpush.bf16.msra.mxu0 %v1185_v16 }
  0x61   :  { %733 = vmatpush.bf16.msra.mxu1 %v1193_v59 }
  0x64   :  { %721 = vmatpush.bf16.msra.mxu0 %v1184_v17 }
  0x65   :  { %734 = vmatpush.bf16.msra.mxu1 %v1192_v22 }
  0x68   :  { %722 = vmatpush.bf16.msra.mxu0 %v1183_v18 }
  0x69   :  { %735 = vmatpush.bf16.msra.mxu1 %v1191_v24 }
  0x6c   :  { %723 = vmatpush.bf16.msra.mxu0 %v1182_v19 }
  0x6d   :  { %736 = vmatpush.bf16.msra.mxu1 %v1190_v29 }
  0x70   :  { %724 = vmatpush.bf16.msra.mxu0 %v1181_v58 }
  0x71   :  { %737 = vmatpush.bf16.msra.mxu1 %v1189_v35 }
  0xb0   :  { %v486_v25 = vpop.f32.mrf.mxu0 }
  0xb1   :  { %v487_v26 = vadd.f32 %v486_v25, %v153_v23  ;;  %v499_v27 = vpop.f32.mrf.mxu1 }
  0xb3   :  { %v500_v28 = vadd.f32 %v499_v27, %v487_v26 }
  0xb8   :  { %v512_v30 = vpop.f32.mrf.mxu2  ;;  %v488_v34 = vpop.f32.mrf.mxu0 }
  0xb9   :  { %v513_v31 = vadd.f32 %v512_v30, %v500_v28  ;;  %v525_v32 = vpop.f32.mrf.mxu3  ;;  %v501_v36 = vpop.f32.mrf.mxu1 }
  0xbb   :  { %v526_v33 = vadd.f32 %v525_v32, %v513_v31 }
  0xbd   :  { %v581_v37 = vmax.f32 %v526_v33, 0.0 }
  0xbf   :  { %v583_v38 = vpack.c.bf16 %v581_v37, %v581_v37 }
  0xc0   :  { %v514_v39 = vpop.f32.mrf.mxu2 }
  0xc1   :  { %725 = vmatmul.bf16.vlgmr.msra.gmra.mxu0 %v583_v38  ;;  %v527_v40 = vpop.f32.mrf.mxu3 }
  0xd0   :  { %v538_v42 = vpop.f32.mrf.mxu0 }
  0xd1   :  { %v539_v43 = vadd.f32 %v538_v42, %v154_v41  ;;  %v551_v44 = vpop.f32.mrf.mxu1 }
  0xd3   :  { %v552_v45 = vadd.f32 %v551_v44, %v539_v43 }
  0xd8   :  { %v564_v46 = vpop.f32.mrf.mxu2  ;;  %v540_v49 = vpop.f32.mrf.mxu0 }
  0xd9   :  { %v565_v47 = vadd.f32 %v564_v46, %v552_v45  ;;  %v577_v48 = vpop.f32.mrf.mxu3  ;;  %v553_v50 = vpop.f32.mrf.mxu1 }
  0xdb   :  { %v578_v51 = vadd.f32 %v577_v48, %v565_v47 }
  0xdd   :  { %v582_v52 = vmax.f32 %v578_v51, 0.0 }
  0xdf   :  { %v584_v53 = vpack.c.bf16 %v582_v52, %v582_v52 }
  0xe0   :  { %v566_v54 = vpop.f32.mrf.mxu2 }
  0xe1   :  { %v579_v56 = vpop.f32.mrf.mxu3  ;;  %738 = vmatmul.bf16.vlgmr.msra.gmra.mxu1 %v584_v53 }
 0x13e   :  { %v726_v57 = vpop.f32.mrf.mxu0 }
 0x13f   :  { %v727_v1 = vadd.f32 %v1207_v63, %v726_v57 }
 0x146   :  { %v728_v60 = vpop.f32.mrf.mxu0 }
 0x15e   :  { %v739_v2 = vpop.f32.mrf.mxu1 }
 0x15f   :  { %v740_v3 = vadd.f32 %v739_v2, %v727_v1 }
 0x161   :  { %v743_v5 = vmax.f32 %v740_v3, 0.0 }
 0x163   :  { %v747_v6 = vmul.f32 %v746_v4, %v743_v5 }
 0x165   :  { %748 = vadd.xlane.f32.xlu0 %v747_v6 }
 0x166   :  { %v741_v7 = vpop.f32.mrf.mxu1 }
 0x1d8   :  { %v749_v9 = vpop.xlane.xlu0 %748 }
 0x1d9   :  { %v754_v10 = vadd.f32 %v1208_v8, %v749_v9 }
 0x1db   :  { %1209 = vtanh.f32 %v754_v10 }
 0x1e1   :  { %v1210_v12 = vpop.eup %1209 }
 0x1e2   :  { %v759_v13 = vsub.f32 %v1210_v12, %v758_v11  ;;  %757 = vst.msk [vmem:[%s1425_s8] sm:$0xff] %vm756_vm0, %v1210_v12 }
 0x1e4   :  { %v760_v14 = vmul.f32 %v759_v13, %v759_v13 }
 0x1e6   :  { %v761_v15 = vsel %vm756_vm0, %v760_v14, 0.0 }
 0x1e7   :  { %762 = vadd.xlane.f32.xlu0 %v761_v15 }
 0x25a   :  { %v763_v16 = vpop.xlane.xlu0 %762 }
 0x25b   :  { %v764_v17 = vrot.slane %v763_v16, 4 }
 0x25d   :  { %v765_v18 = vadd.f32 %v764_v17, %v763_v16 }
 0x25f   :  { %v766_v19 = vrot.slane %v765_v18, 2 }
 0x261   :  { %v767_v20 = vadd.f32 %v766_v19, %v765_v18 }
 0x263   :  { %v768_v58 = vrot.slane %v767_v20, 1 }
 0x265   :  { %v769_v21 = vadd.f32 %v768_v58, %v767_v20 }
 0x267   :  { %1197 = vpush %v769_v21 }
 0x298   :  { %s1198_s16 = spop %1197 }
 0x299   :  { %s771_s17 = smul.f32 0.125, %s1198_s16 }
 0x29b   :  { %v772_v55 = vstv %s771_s17 }
 0x29c   :  { %774 = vst.msk [vmem:[#allocation9] sm:$0x1] %vm773_vm1, %v772_v55 }
 0x29d   :  { %787 = dma.vmem_to_hbm [thread:$0]  %s783_s13, 16, %s785_s15, [#allocation5]  }
 0x29e   :  { %1311 = dma.done.wait [#allocation5], 16  }
 0x29f   :  { %1312 = vsyncadd [#allocation5], 4294967280 }
 0x2a0   :  { %794 = vsyncpa [#allocation4], 1 }
 0x2a1   :  { %795 = vsyncpa [#allocation7], 1 }
 0x2a2   :  { %796 = vsyncpa [#allocation5], 1 }

</bundles_post_ra>
